<compile_context>
chip_gen: v7x
topology: tpu7x:2x2x1
jax: 0.10.0
libtpu: 0.0.40
codegen_flags: <defaults>
</compile_context>

<pallas_src>
import functools
import math

import jax
import jax.numpy as jnp
from jax import lax
from jax.experimental import pallas as pl
from jax.experimental.pallas import tpu as pltpu


def _coattn_kernel(recv_ref, attd_ref, wk_ref, wqt_ref, bias_ref, a_ref, out_ref,
                   *, compute_dtype):
    # recv_ref: (1, tNr, F)   attd_ref: (1, tNa, F)
    # wk_ref:   (F, H)        wqt_ref:  (H, F)   (w_q pre-transposed outside)
    # bias_ref: (1, H) f32    a_ref:    (1, H) f32
    # out_ref:  (1, tNr, tNa) f32
    recv = recv_ref[0].astype(compute_dtype)          # (tNr, F)
    attd = attd_ref[0].astype(compute_dtype)          # (tNa, F)
    wk = wk_ref[...].astype(compute_dtype)            # (F, H)
    wqt = wqt_ref[...].astype(compute_dtype)          # (H, F)

    # keys with the bias folded in once: (tNr, H), Nr on the sublane axis.
    keys = (jnp.dot(recv, wk, preferred_element_type=jnp.float32)
            + bias_ref[...]).astype(compute_dtype)

    # queries produced already transposed: (H, tNa), Na on the lane axis.
    # dot_general contracts the feature dim of both operands (rhs-transposed
    # matmul, same pattern as q @ k^T in flash attention) -> no XLU transpose.
    q_t = lax.dot_general(
        wqt, attd,
        dimension_numbers=(((1,), (1,)), ((), ())),
        preferred_element_type=jnp.float32).astype(compute_dtype)

    a_row = a_ref[...]                                # (1, H) f32
    tNr = recv.shape[0]
    tNa = attd.shape[0]
    H = keys.shape[1]

    # Lane-dense (tNr, tNa) accumulator; H is small and static -> fully unrolled
    # static Python loop (static slices, no dynamic_slice).
    acc = jnp.zeros((tNr, tNa), jnp.float32)
    for h in range(H):
        k_col = keys[:, h:h + 1]                      # (tNr, 1) -> lane broadcast
        q_row = q_t[h:h + 1, :]                       # (1, tNa) -> sublane broadcast
        t = jnp.tanh(k_col + q_row)                   # (tNr, tNa), 128-lane dense
        acc = acc + a_row[0:1, h:h + 1] * t.astype(jnp.float32)

    out_ref[0] = acc.astype(out_ref.dtype)


def _round_up(x, m):
    return (x + m - 1) // m * m


def co_attention(receiver, attendant, w_k, w_q, bias, a, *,
                 tile_nr=256, tile_na=512, compute_dtype=jnp.float32):
    """attentions[b,i,j] = tanh(attendant[b,j]@w_q + receiver[b,i]@w_k + bias) . a

    compute_dtype=jnp.bfloat16 is recommended on v6e/v7x (bf16 VPU/EUP/MXU);
    keep the default jnp.float32 on v5e.  Accumulation is always f32.
    """
    B, Nr, F = receiver.shape
    _, Na, _ = attendant.shape
    H = w_k.shape[1]

    # Nr tiles on the sublane axis (multiple of 8), Na tiles on the lane axis
    # (multiple of 128 -> lane-dense, unmasked output stores).
    tNr = min(tile_nr, _round_up(Nr, 8))
    tNa = min(tile_na, _round_up(Na, 128))
    Nr_p = _round_up(Nr, tNr)
    Na_p = _round_up(Na, tNa)

    if Nr_p != Nr:
        receiver = jnp.pad(receiver, ((0, 0), (0, Nr_p - Nr), (0, 0)))
    if Na_p != Na:
        attendant = jnp.pad(attendant, ((0, 0), (0, Na_p - Na), (0, 0)))

    w_q_t = jnp.transpose(w_q)                        # (H, F): tiny, done once outside
    bias2d = bias.reshape(1, H).astype(jnp.float32)
    a2d = a.reshape(1, H).astype(jnp.float32)

    kernel = functools.partial(_coattn_kernel, compute_dtype=compute_dtype)

    out = pl.pallas_call(
        kernel,
        out_shape=jax.ShapeDtypeStruct((B, Nr_p, Na_p), jnp.float32),
        grid_spec=pltpu.PrefetchScalarGridSpec(
            num_scalar_prefetch=0,
            grid=(B, Nr_p // tNr, Na_p // tNa),
            in_specs=[
                pl.BlockSpec((1, tNr, F), lambda b, i, j: (b, i, 0)),
                pl.BlockSpec((1, tNa, F), lambda b, i, j: (b, j, 0)),
                pl.BlockSpec((F, H), lambda b, i, j: (0, 0)),   # w_k (grid-invariant)
                pl.BlockSpec((H, F), lambda b, i, j: (0, 0)),   # w_q^T (grid-invariant)
                pl.BlockSpec((1, H), lambda b, i, j: (0, 0)),   # bias
                pl.BlockSpec((1, H), lambda b, i, j: (0, 0)),   # a
            ],
            out_specs=pl.BlockSpec((1, tNr, tNa), lambda b, i, j: (b, i, j)),
        ),
        compiler_params=pltpu.CompilerParams(
            dimension_semantics=("parallel", "parallel", "parallel"),
        ),
    )(receiver, attendant, w_k, w_q_t, bias2d, a2d)

    if Nr_p != Nr or Na_p != Na:
        out = out[:, :Nr, :Na]
    return out


def _xavier_uniform(key, shape, fan_in, fan_out, dtype=jnp.float32):
    bound = math.sqrt(6.0 / (fan_in + fan_out))
    return jax.random.uniform(key, shape, dtype=dtype, minval=-bound, maxval=bound)


def _reference(receiver, attendant, w_k, w_q, bias, a):
    keys = receiver @ w_k
    queries = attendant @ w_q
    e_act = queries[..., None, :, :] + keys[..., :, None, :] + bias
    return jnp.tanh(e_act) @ a


if __name__ == "__main__":
    B, Nr, Na, F = 2, 12, 20, 32
    H = F // 2

    key = jax.random.PRNGKey(0)
    k_recv, k_attd, k_wq, k_wk, k_b, k_a = jax.random.split(key, 6)

    receiver = jax.random.normal(k_recv, (B, Nr, F), dtype=jnp.float32)
    attendant = jax.random.normal(k_attd, (B, Na, F), dtype=jnp.float32)

    # Deterministic parameter init mirroring nn.init.xavier_uniform_ semantics.
    # w_q, w_k shape (F, H): PyTorch fan_in = H, fan_out = F.
    w_q = _xavier_uniform(k_wq, (F, H), fan_in=H, fan_out=F)
    w_k = _xavier_uniform(k_wk, (F, H), fan_in=H, fan_out=F)
    # bias/a viewed as (H, 1): fan_in = 1, fan_out = H.
    bias = _xavier_uniform(k_b, (H,), fan_in=1, fan_out=H)
    a = _xavier_uniform(k_a, (H,), fan_in=1, fan_out=H)

    ref = _reference(receiver, attendant, w_k, w_q, bias, a)

    # f32 path (exact-semantics default; use this on v5e).
    out = co_attention(receiver, attendant, w_k, w_q, bias, a)
    out = jax.block_until_ready(out)
    assert out.shape == (B, Nr, Na)
    assert jnp.allclose(out, ref, atol=1e-4, rtol=1e-4), "f32 kernel mismatch vs reference"

    # bf16 element-wise path (recommended on v6e/v7x); H-sum still accumulated in f32.
    out_bf16 = co_attention(receiver, attendant, w_k, w_q, bias, a,
                            compute_dtype=jnp.bfloat16)
    out_bf16 = jax.block_until_ready(out_bf16)
    assert out_bf16.shape == (B, Nr, Na)
    assert jnp.allclose(out_bf16, ref, atol=5e-2, rtol=5e-2), "bf16 kernel mismatch vs reference"

    print("KERNEL_OK")
</pallas_src>

<mosaic_0001>
module attributes {stable_mosaic.version = 11 : i64} {
  func.func @_coattn_kernel(%arg0: i32, %arg1: i32, %arg2: i32, %arg3: memref<1x16x32xf32, #tpu.memory_space<vmem>>, %arg4: memref<1x128x32xf32, #tpu.memory_space<vmem>>, %arg5: memref<32x16xf32, #tpu.memory_space<vmem>>, %arg6: memref<16x32xf32, #tpu.memory_space<vmem>>, %arg7: memref<1x16xf32, #tpu.memory_space<vmem>>, %arg8: memref<1x16xf32, #tpu.memory_space<vmem>>, %arg9: memref<1x16x128xf32, #tpu.memory_space<vmem>>) attributes {dimension_semantics = [#tpu.dimension_semantics<parallel>, #tpu.dimension_semantics<parallel>, #tpu.dimension_semantics<parallel>], iteration_bounds = array<i64: 2, 1, 1>, scalar_prefetch = 0 : i64, scratch_operands = 0 : i64, tpu.core_type = #tpu.core_type<tc>, window_params = [{transform_indices = @transform_0, window_bounds = array<i64: 1, 16, 32>}, {transform_indices = @transform_1, window_bounds = array<i64: 1, 128, 32>}, {pipeline_mode = #tpu.pipeline_mode<synchronous>, transform_indices = @transform_2, window_bounds = array<i64: 32, 16>}, {pipeline_mode = #tpu.pipeline_mode<synchronous>, transform_indices = @transform_3, window_bounds = array<i64: 16, 32>}, {pipeline_mode = #tpu.pipeline_mode<synchronous>, transform_indices = @transform_4, window_bounds = array<i64: 1, 16>}, {pipeline_mode = #tpu.pipeline_mode<synchronous>, transform_indices = @transform_5, window_bounds = array<i64: 1, 16>}, {transform_indices = @transform_6, window_bounds = array<i64: 1, 16, 128>}]} {
    %c0 = arith.constant 0 : index
    %c0_0 = arith.constant 0 : index
    %c0_1 = arith.constant 0 : index
    %0 = vector.load %arg3[%c0, %c0_0, %c0_1] : memref<1x16x32xf32, #tpu.memory_space<vmem>>, vector<1x16x32xf32>
    %1 = vector.shape_cast %0 : vector<1x16x32xf32> to vector<16x32xf32>
    %c0_2 = arith.constant 0 : index
    %c0_3 = arith.constant 0 : index
    %c0_4 = arith.constant 0 : index
    %2 = vector.load %arg4[%c0_2, %c0_3, %c0_4] : memref<1x128x32xf32, #tpu.memory_space<vmem>>, vector<1x128x32xf32>
    %3 = vector.shape_cast %2 : vector<1x128x32xf32> to vector<128x32xf32>
    %c0_5 = arith.constant 0 : index
    %c0_6 = arith.constant 0 : index
    %4 = vector.load %arg5[%c0_5, %c0_6] : memref<32x16xf32, #tpu.memory_space<vmem>>, vector<32x16xf32>
    %c0_7 = arith.constant 0 : index
    %c0_8 = arith.constant 0 : index
    %5 = vector.load %arg6[%c0_7, %c0_8] : memref<16x32xf32, #tpu.memory_space<vmem>>, vector<16x32xf32>
    %cst = arith.constant dense<0.000000e+00> : vector<16x16xf32>
    %6 = tpu.matmul %1, %4, %cst {dimension_numbers = #tpu.dot_dimension_numbers<[1], [0], [0], [1], [0, 0, 1, 1], [], []>} : vector<16x32xf32>, vector<32x16xf32>, vector<16x16xf32> -> vector<16x16xf32>
    %c0_9 = arith.constant 0 : index
    %c0_10 = arith.constant 0 : index
    %7 = vector.load %arg7[%c0_9, %c0_10] : memref<1x16xf32, #tpu.memory_space<vmem>>, vector<1x16xf32>
    %8 = vector.broadcast %7 : vector<1x16xf32> to vector<16x16xf32>
    %9 = arith.addf %6, %8 : vector<16x16xf32>
    %cst_11 = arith.constant dense<0.000000e+00> : vector<16x128xf32>
    %10 = tpu.matmul %5, %3, %cst_11 {dimension_numbers = #tpu.dot_dimension_numbers<[1], [1], [0], [0], [0, 0, 1, 0], [], []>} : vector<16x32xf32>, vector<128x32xf32>, vector<16x128xf32> -> vector<16x128xf32>
    %c0_12 = arith.constant 0 : index
    %c0_13 = arith.constant 0 : index
    %11 = vector.load %arg8[%c0_12, %c0_13] : memref<1x16xf32, #tpu.memory_space<vmem>>, vector<1x16xf32>
    %cst_14 = arith.constant 0.000000e+00 : f32
    %12 = vector.broadcast %cst_14 : f32 to vector<16x128xf32>
    %13 = vector.extract_strided_slice %9 {offsets = [0, 0], sizes = [16, 1], strides = [1, 1]} : vector<16x16xf32> to vector<16x1xf32>
    %14 = vector.extract_strided_slice %10 {offsets = [0, 0], sizes = [1, 128], strides = [1, 1]} : vector<16x128xf32> to vector<1x128xf32>
    %15 = vector.broadcast %13 : vector<16x1xf32> to vector<16x128xf32>
    %16 = vector.broadcast %14 : vector<1x128xf32> to vector<16x128xf32>
    %17 = arith.addf %15, %16 : vector<16x128xf32>
    %18 = math.tanh %17 : vector<16x128xf32>
    %19 = vector.extract_strided_slice %11 {offsets = [0, 0], sizes = [1, 1], strides = [1, 1]} : vector<1x16xf32> to vector<1x1xf32>
    %20 = vector.broadcast %19 : vector<1x1xf32> to vector<16x128xf32>
    %21 = arith.mulf %20, %18 : vector<16x128xf32>
    %22 = arith.addf %12, %21 : vector<16x128xf32>
    %23 = vector.extract_strided_slice %9 {offsets = [0, 1], sizes = [16, 1], strides = [1, 1]} : vector<16x16xf32> to vector<16x1xf32>
    %24 = vector.extract_strided_slice %10 {offsets = [1, 0], sizes = [1, 128], strides = [1, 1]} : vector<16x128xf32> to vector<1x128xf32>
    %25 = vector.broadcast %23 : vector<16x1xf32> to vector<16x128xf32>
    %26 = vector.broadcast %24 : vector<1x128xf32> to vector<16x128xf32>
    %27 = arith.addf %25, %26 : vector<16x128xf32>
    %28 = math.tanh %27 : vector<16x128xf32>
    %29 = vector.extract_strided_slice %11 {offsets = [0, 1], sizes = [1, 1], strides = [1, 1]} : vector<1x16xf32> to vector<1x1xf32>
    %30 = vector.broadcast %29 : vector<1x1xf32> to vector<16x128xf32>
    %31 = arith.mulf %30, %28 : vector<16x128xf32>
    %32 = arith.addf %22, %31 : vector<16x128xf32>
    %33 = vector.extract_strided_slice %9 {offsets = [0, 2], sizes = [16, 1], strides = [1, 1]} : vector<16x16xf32> to vector<16x1xf32>
    %34 = vector.extract_strided_slice %10 {offsets = [2, 0], sizes = [1, 128], strides = [1, 1]} : vector<16x128xf32> to vector<1x128xf32>
    %35 = vector.broadcast %33 : vector<16x1xf32> to vector<16x128xf32>
    %36 = vector.broadcast %34 : vector<1x128xf32> to vector<16x128xf32>
    %37 = arith.addf %35, %36 : vector<16x128xf32>
    %38 = math.tanh %37 : vector<16x128xf32>
    %39 = vector.extract_strided_slice %11 {offsets = [0, 2], sizes = [1, 1], strides = [1, 1]} : vector<1x16xf32> to vector<1x1xf32>
    %40 = vector.broadcast %39 : vector<1x1xf32> to vector<16x128xf32>
    %41 = arith.mulf %40, %38 : vector<16x128xf32>
    %42 = arith.addf %32, %41 : vector<16x128xf32>
    %43 = vector.extract_strided_slice %9 {offsets = [0, 3], sizes = [16, 1], strides = [1, 1]} : vector<16x16xf32> to vector<16x1xf32>
    %44 = vector.extract_strided_slice %10 {offsets = [3, 0], sizes = [1, 128], strides = [1, 1]} : vector<16x128xf32> to vector<1x128xf32>
    %45 = vector.broadcast %43 : vector<16x1xf32> to vector<16x128xf32>
    %46 = vector.broadcast %44 : vector<1x128xf32> to vector<16x128xf32>
    %47 = arith.addf %45, %46 : vector<16x128xf32>
    %48 = math.tanh %47 : vector<16x128xf32>
    %49 = vector.extract_strided_slice %11 {offsets = [0, 3], sizes = [1, 1], strides = [1, 1]} : vector<1x16xf32> to vector<1x1xf32>
    %50 = vector.broadcast %49 : vector<1x1xf32> to vector<16x128xf32>
    %51 = arith.mulf %50, %48 : vector<16x128xf32>
    %52 = arith.addf %42, %51 : vector<16x128xf32>
    %53 = vector.extract_strided_slice %9 {offsets = [0, 4], sizes = [16, 1], strides = [1, 1]} : vector<16x16xf32> to vector<16x1xf32>
    %54 = vector.extract_strided_slice %10 {offsets = [4, 0], sizes = [1, 128], strides = [1, 1]} : vector<16x128xf32> to vector<1x128xf32>
    %55 = vector.broadcast %53 : vector<16x1xf32> to vector<16x128xf32>
    %56 = vector.broadcast %54 : vector<1x128xf32> to vector<16x128xf32>
    %57 = arith.addf %55, %56 : vector<16x128xf32>
    %58 = math.tanh %57 : vector<16x128xf32>
    %59 = vector.extract_strided_slice %11 {offsets = [0, 4], sizes = [1, 1], strides = [1, 1]} : vector<1x16xf32> to vector<1x1xf32>
    %60 = vector.broadcast %59 : vector<1x1xf32> to vector<16x128xf32>
    %61 = arith.mulf %60, %58 : vector<16x128xf32>
    %62 = arith.addf %52, %61 : vector<16x128xf32>
    %63 = vector.extract_strided_slice %9 {offsets = [0, 5], sizes = [16, 1], strides = [1, 1]} : vector<16x16xf32> to vector<16x1xf32>
    %64 = vector.extract_strided_slice %10 {offsets = [5, 0], sizes = [1, 128], strides = [1, 1]} : vector<16x128xf32> to vector<1x128xf32>
    %65 = vector.broadcast %63 : vector<16x1xf32> to vector<16x128xf32>
    %66 = vector.broadcast %64 : vector<1x128xf32> to vector<16x128xf32>
    %67 = arith.addf %65, %66 : vector<16x128xf32>
    %68 = math.tanh %67 : vector<16x128xf32>
    %69 = vector.extract_strided_slice %11 {offsets = [0, 5], sizes = [1, 1], strides = [1, 1]} : vector<1x16xf32> to vector<1x1xf32>
    %70 = vector.broadcast %69 : vector<1x1xf32> to vector<16x128xf32>
    %71 = arith.mulf %70, %68 : vector<16x128xf32>
    %72 = arith.addf %62, %71 : vector<16x128xf32>
    %73 = vector.extract_strided_slice %9 {offsets = [0, 6], sizes = [16, 1], strides = [1, 1]} : vector<16x16xf32> to vector<16x1xf32>
    %74 = vector.extract_strided_slice %10 {offsets = [6, 0], sizes = [1, 128], strides = [1, 1]} : vector<16x128xf32> to vector<1x128xf32>
    %75 = vector.broadcast %73 : vector<16x1xf32> to vector<16x128xf32>
    %76 = vector.broadcast %74 : vector<1x128xf32> to vector<16x128xf32>
    %77 = arith.addf %75, %76 : vector<16x128xf32>
    %78 = math.tanh %77 : vector<16x128xf32>
    %79 = vector.extract_strided_slice %11 {offsets = [0, 6], sizes = [1, 1], strides = [1, 1]} : vector<1x16xf32> to vector<1x1xf32>
    %80 = vector.broadcast %79 : vector<1x1xf32> to vector<16x128xf32>
    %81 = arith.mulf %80, %78 : vector<16x128xf32>
    %82 = arith.addf %72, %81 : vector<16x128xf32>
    %83 = vector.extract_strided_slice %9 {offsets = [0, 7], sizes = [16, 1], strides = [1, 1]} : vector<16x16xf32> to vector<16x1xf32>
    %84 = vector.extract_strided_slice %10 {offsets = [7, 0], sizes = [1, 128], strides = [1, 1]} : vector<16x128xf32> to vector<1x128xf32>
    %85 = vector.broadcast %83 : vector<16x1xf32> to vector<16x128xf32>
    %86 = vector.broadcast %84 : vector<1x128xf32> to vector<16x128xf32>
    %87 = arith.addf %85, %86 : vector<16x128xf32>
    %88 = math.tanh %87 : vector<16x128xf32>
    %89 = vector.extract_strided_slice %11 {offsets = [0, 7], sizes = [1, 1], strides = [1, 1]} : vector<1x16xf32> to vector<1x1xf32>
    %90 = vector.broadcast %89 : vector<1x1xf32> to vector<16x128xf32>
    %91 = arith.mulf %90, %88 : vector<16x128xf32>
    %92 = arith.addf %82, %91 : vector<16x128xf32>
    %93 = vector.extract_strided_slice %9 {offsets = [0, 8], sizes = [16, 1], strides = [1, 1]} : vector<16x16xf32> to vector<16x1xf32>
    %94 = vector.extract_strided_slice %10 {offsets = [8, 0], sizes = [1, 128], strides = [1, 1]} : vector<16x128xf32> to vector<1x128xf32>
    %95 = vector.broadcast %93 : vector<16x1xf32> to vector<16x128xf32>
    %96 = vector.broadcast %94 : vector<1x128xf32> to vector<16x128xf32>
    %97 = arith.addf %95, %96 : vector<16x128xf32>
    %98 = math.tanh %97 : vector<16x128xf32>
    %99 = vector.extract_strided_slice %11 {offsets = [0, 8], sizes = [1, 1], strides = [1, 1]} : vector<1x16xf32> to vector<1x1xf32>
    %100 = vector.broadcast %99 : vector<1x1xf32> to vector<16x128xf32>
    %101 = arith.mulf %100, %98 : vector<16x128xf32>
    %102 = arith.addf %92, %101 : vector<16x128xf32>
    %103 = vector.extract_strided_slice %9 {offsets = [0, 9], sizes = [16, 1], strides = [1, 1]} : vector<16x16xf32> to vector<16x1xf32>
    %104 = vector.extract_strided_slice %10 {offsets = [9, 0], sizes = [1, 128], strides = [1, 1]} : vector<16x128xf32> to vector<1x128xf32>
    %105 = vector.broadcast %103 : vector<16x1xf32> to vector<16x128xf32>
    %106 = vector.broadcast %104 : vector<1x128xf32> to vector<16x128xf32>
    %107 = arith.addf %105, %106 : vector<16x128xf32>
    %108 = math.tanh %107 : vector<16x128xf32>
    %109 = vector.extract_strided_slice %11 {offsets = [0, 9], sizes = [1, 1], strides = [1, 1]} : vector<1x16xf32> to vector<1x1xf32>
    %110 = vector.broadcast %109 : vector<1x1xf32> to vector<16x128xf32>
    %111 = arith.mulf %110, %108 : vector<16x128xf32>
    %112 = arith.addf %102, %111 : vector<16x128xf32>
    %113 = vector.extract_strided_slice %9 {offsets = [0, 10], sizes = [16, 1], strides = [1, 1]} : vector<16x16xf32> to vector<16x1xf32>
    %114 = vector.extract_strided_slice %10 {offsets = [10, 0], sizes = [1, 128], strides = [1, 1]} : vector<16x128xf32> to vector<1x128xf32>
    %115 = vector.broadcast %113 : vector<16x1xf32> to vector<16x128xf32>
    %116 = vector.broadcast %114 : vector<1x128xf32> to vector<16x128xf32>
    %117 = arith.addf %115, %116 : vector<16x128xf32>
    %118 = math.tanh %117 : vector<16x128xf32>
    %119 = vector.extract_strided_slice %11 {offsets = [0, 10], sizes = [1, 1], strides = [1, 1]} : vector<1x16xf32> to vector<1x1xf32>
    %120 = vector.broadcast %119 : vector<1x1xf32> to vector<16x128xf32>
    %121 = arith.mulf %120, %118 : vector<16x128xf32>
    %122 = arith.addf %112, %121 : vector<16x128xf32>
    %123 = vector.extract_strided_slice %9 {offsets = [0, 11], sizes = [16, 1], strides = [1, 1]} : vector<16x16xf32> to vector<16x1xf32>
    %124 = vector.extract_strided_slice %10 {offsets = [11, 0], sizes = [1, 128], strides = [1, 1]} : vector<16x128xf32> to vector<1x128xf32>
    %125 = vector.broadcast %123 : vector<16x1xf32> to vector<16x128xf32>
    %126 = vector.broadcast %124 : vector<1x128xf32> to vector<16x128xf32>
    %127 = arith.addf %125, %126 : vector<16x128xf32>
    %128 = math.tanh %127 : vector<16x128xf32>
    %129 = vector.extract_strided_slice %11 {offsets = [0, 11], sizes = [1, 1], strides = [1, 1]} : vector<1x16xf32> to vector<1x1xf32>
    %130 = vector.broadcast %129 : vector<1x1xf32> to vector<16x128xf32>
    %131 = arith.mulf %130, %128 : vector<16x128xf32>
    %132 = arith.addf %122, %131 : vector<16x128xf32>
    %133 = vector.extract_strided_slice %9 {offsets = [0, 12], sizes = [16, 1], strides = [1, 1]} : vector<16x16xf32> to vector<16x1xf32>
    %134 = vector.extract_strided_slice %10 {offsets = [12, 0], sizes = [1, 128], strides = [1, 1]} : vector<16x128xf32> to vector<1x128xf32>
    %135 = vector.broadcast %133 : vector<16x1xf32> to vector<16x128xf32>
    %136 = vector.broadcast %134 : vector<1x128xf32> to vector<16x128xf32>
    %137 = arith.addf %135, %136 : vector<16x128xf32>
    %138 = math.tanh %137 : vector<16x128xf32>
    %139 = vector.extract_strided_slice %11 {offsets = [0, 12], sizes = [1, 1], strides = [1, 1]} : vector<1x16xf32> to vector<1x1xf32>
    %140 = vector.broadcast %139 : vector<1x1xf32> to vector<16x128xf32>
    %141 = arith.mulf %140, %138 : vector<16x128xf32>
    %142 = arith.addf %132, %141 : vector<16x128xf32>
    %143 = vector.extract_strided_slice %9 {offsets = [0, 13], sizes = [16, 1], strides = [1, 1]} : vector<16x16xf32> to vector<16x1xf32>
    %144 = vector.extract_strided_slice %10 {offsets = [13, 0], sizes = [1, 128], strides = [1, 1]} : vector<16x128xf32> to vector<1x128xf32>
    %145 = vector.broadcast %143 : vector<16x1xf32> to vector<16x128xf32>
    %146 = vector.broadcast %144 : vector<1x128xf32> to vector<16x128xf32>
    %147 = arith.addf %145, %146 : vector<16x128xf32>
    %148 = math.tanh %147 : vector<16x128xf32>
    %149 = vector.extract_strided_slice %11 {offsets = [0, 13], sizes = [1, 1], strides = [1, 1]} : vector<1x16xf32> to vector<1x1xf32>
    %150 = vector.broadcast %149 : vector<1x1xf32> to vector<16x128xf32>
    %151 = arith.mulf %150, %148 : vector<16x128xf32>
    %152 = arith.addf %142, %151 : vector<16x128xf32>
    %153 = vector.extract_strided_slice %9 {offsets = [0, 14], sizes = [16, 1], strides = [1, 1]} : vector<16x16xf32> to vector<16x1xf32>
    %154 = vector.extract_strided_slice %10 {offsets = [14, 0], sizes = [1, 128], strides = [1, 1]} : vector<16x128xf32> to vector<1x128xf32>
    %155 = vector.broadcast %153 : vector<16x1xf32> to vector<16x128xf32>
    %156 = vector.broadcast %154 : vector<1x128xf32> to vector<16x128xf32>
    %157 = arith.addf %155, %156 : vector<16x128xf32>
    %158 = math.tanh %157 : vector<16x128xf32>
    %159 = vector.extract_strided_slice %11 {offsets = [0, 14], sizes = [1, 1], strides = [1, 1]} : vector<1x16xf32> to vector<1x1xf32>
    %160 = vector.broadcast %159 : vector<1x1xf32> to vector<16x128xf32>
    %161 = arith.mulf %160, %158 : vector<16x128xf32>
    %162 = arith.addf %152, %161 : vector<16x128xf32>
    %163 = vector.extract_strided_slice %9 {offsets = [0, 15], sizes = [16, 1], strides = [1, 1]} : vector<16x16xf32> to vector<16x1xf32>
    %164 = vector.extract_strided_slice %10 {offsets = [15, 0], sizes = [1, 128], strides = [1, 1]} : vector<16x128xf32> to vector<1x128xf32>
    %165 = vector.broadcast %163 : vector<16x1xf32> to vector<16x128xf32>
    %166 = vector.broadcast %164 : vector<1x128xf32> to vector<16x128xf32>
    %167 = arith.addf %165, %166 : vector<16x128xf32>
    %168 = math.tanh %167 : vector<16x128xf32>
    %169 = vector.extract_strided_slice %11 {offsets = [0, 15], sizes = [1, 1], strides = [1, 1]} : vector<1x16xf32> to vector<1x1xf32>
    %170 = vector.broadcast %169 : vector<1x1xf32> to vector<16x128xf32>
    %171 = arith.mulf %170, %168 : vector<16x128xf32>
    %172 = arith.addf %162, %171 : vector<16x128xf32>
    %c0_15 = arith.constant 0 : index
    %c0_16 = arith.constant 0 : index
    %c0_17 = arith.constant 0 : index
    %173 = vector.load %arg9[%c0_15, %c0_16, %c0_17] : memref<1x16x128xf32, #tpu.memory_space<vmem>>, vector<1x16x128xf32>
    %174 = vector.shape_cast %173 : vector<1x16x128xf32> to vector<16x128xf32>
    %175 = vector.shape_cast %172 : vector<16x128xf32> to vector<1x16x128xf32>
    tpu.vector_store %arg9[%c0_15, %c0_16, %c0_17], %175 {strides = array<i32>} : memref<1x16x128xf32, #tpu.memory_space<vmem>>, vector<1x16x128xf32>,
    return
  }
  func.func @transform_0(%arg0: i32, %arg1: i32, %arg2: i32) -> (i32, i32, i32) {
    %c0_i32 = arith.constant 0 : i32
    %c0_i32_0 = arith.constant 0 : i32
    return %arg0, %arg1, %c0_i32 : i32, i32, i32
  }
  func.func @transform_1(%arg0: i32, %arg1: i32, %arg2: i32) -> (i32, i32, i32) {
    %c0_i32 = arith.constant 0 : i32
    %c0_i32_0 = arith.constant 0 : i32
    return %arg0, %arg2, %c0_i32 : i32, i32, i32
  }
  func.func @transform_2(%arg0: i32, %arg1: i32, %arg2: i32) -> (i32, i32) {
    %c0_i32 = arith.constant 0 : i32
    %c0_i32_0 = arith.constant 0 : i32
    %c0_i32_1 = arith.constant 0 : i32
    return %c0_i32, %c0_i32_0 : i32, i32
  }
  func.func @transform_3(%arg0: i32, %arg1: i32, %arg2: i32) -> (i32, i32) {
    %c0_i32 = arith.constant 0 : i32
    %c0_i32_0 = arith.constant 0 : i32
    %c0_i32_1 = arith.constant 0 : i32
    return %c0_i32, %c0_i32_0 : i32, i32
  }
  func.func @transform_4(%arg0: i32, %arg1: i32, %arg2: i32) -> (i32, i32) {
    %c0_i32 = arith.constant 0 : i32
    %c0_i32_0 = arith.constant 0 : i32
    %c0_i32_1 = arith.constant 0 : i32
    return %c0_i32, %c0_i32_0 : i32, i32
  }
  func.func @transform_5(%arg0: i32, %arg1: i32, %arg2: i32) -> (i32, i32) {
    %c0_i32 = arith.constant 0 : i32
    %c0_i32_0 = arith.constant 0 : i32
    %c0_i32_1 = arith.constant 0 : i32
    return %c0_i32, %c0_i32_0 : i32, i32
  }
  func.func @transform_6(%arg0: i32, %arg1: i32, %arg2: i32) -> (i32, i32, i32) {
    %c0_i32 = arith.constant 0 : i32
    return %arg0, %arg1, %arg2 : i32, i32, i32
  }
}

</mosaic_0001>

<bundles_post_ra>
// kernel: tpu_custom_call.1
= control target key start
LH: loop header
LB: loop body
LE: loop exit
PB: predicated region body
PF: predicated region fallthrough
CT: control target
= control target key end

     0   :  { %11 = vsyncpa [#allocation3], 0  ;;  %s1980_s0 = inlined_call_operand.vmem [shape: f32[2,16,32], index: 0, kind: input, shape index: {}]   ;;  %s1981_s1 = inlined_call_operand.vmem [shape: f32[2,128,32], index: 1, kind: input, shape index: {}]   ;;  %s1982_s2 = inlined_call_operand.vmem [shape: f32[32,16], index: 2, kind: input, shape index: {}]   ;;  %s1983_s3 = inlined_call_operand.vmem [shape: f32[16,32], index: 3, kind: input, shape index: {}]   ;;  %s1984_s4 = inlined_call_operand.vmem [shape: f32[1,16], index: 4, kind: input, shape index: {}]   ;;  %s1985_s5 = inlined_call_operand.vmem [shape: f32[1,16], index: 5, kind: input, shape index: {}]   ;;  %s1986_s6 = inlined_call_operand.hbm [shape: f32[2,16,128], index: 6, kind: output, shape index: {}]  }
   0x1   :  { %13 = vsyncpa [#allocation3 + $0x1], 0  ;;  %s1566_s21 = smov 0   ;;  %s1568_s22 = smov 0  }
   0x2   :  { %s1570_s23 = smov 0   ;;  %s1572_s24 = smov 0  }
   0x3   :  { %s1574_s25 = smov 0   ;;  %s1576_s26 = smov 0  }
   0x4 LB: > { %s1080_s27 = sadd.s32 4294967295, %s1510_s26   ;;  %s1081_s28 = sadd.s32 4294967294, %s1510_s26   ;;  %s1510_s26 = sphi %s1576_s26, %s19_s26   ;;  %s1506_s25 = sphi %s1574_s25, %s1995_s25   ;;  %s1502_s24 = sphi %s1572_s24, %s1994_s24   ;;  %s1498_s23 = sphi %s1570_s23, %s1993_s23   ;;  %s1494_s22 = sphi %s1568_s22, %s1992_s22   ;;  %s1490_s21 = sphi %s1566_s21, %s1991_s21  }
   0x5   : > { %s38_s29 = sadd.s32 1, %s1506_s25  ;;  %s189_s30 = sadd.s32 1, %s1498_s23 }
   0x6   : > { %p40_p0 = scmp.ge.s32.totalorder %s38_s29, 2  ;;  %p199_p1 = scmp.ne.s32.totalorder %s1498_s23, %s1494_s22 }
   0x7   : > { %p200_p2 = scmp.eq.s32.totalorder %s1080_s27, 1  ;;  %p205_p3 = scmp.ne.s32.totalorder %s1494_s22, %s1490_s21 }
   0x8   : > { %s1997_s29 = smov (%p40_p0, %s38_s29), 0  ;;  %p206_p5 = scmp.eq.s32.totalorder %s1081_s28, 1 }
   0x9   : > { %p1606_p4 = por %p200_p2, %p199_p1  ;;  %s182_s8 = ssub.s32 %s1506_s25, %s1997_s29 }
   0xa   : > { %p1084_p6 = scmp.ge.s32.totalorder %s1510_s26, 1  ;;  %p187_p7 = scmp.eq.s32.totalorder %s182_s8, 0 }
   0xb   : > { %p1613_p8 = por %p206_p5, %p205_p3  ;;  %p262_p9 = scmp.lt.s32.totalorder %s1510_s26, 3 }
   0xc   : > { %s1619_s10 = scalar_select %p187_p7, %s1498_s23, %s189_s30  }
   0xd   : > { %p263_p10 = pnand %p1084_p6, %p262_p9 }
   0xe   : > { %v344_v0 = vld [vmem:[%s1982_s2] sm:$0xff] (!%p263_p10)  ;;  %v345_v1 = vld [vmem:[%s1982_s2 + $0x8] sm:$0xff] (!%p263_p10)  ;;  %v346_v2 = vld [vmem:[%s1982_s2 + $0x10] sm:$0xff] (!%p263_p10)  ;;  %p306_p11 = scmp.lt.s32.totalorder (!%p263_p10), %s1502_s24, 1  ;;  %vm357_vm0 = vcmask (!%p263_p10), 261120   ;;  %v1512_v6 = vmov (!%p263_p10), 0  }
   0xf   : > { %266 = sbr.rel (%p263_p10) target bundleno = 494 (0x1ee), region = 44  ;;  %v1190_v3 = vpack.c.bf16 (!%p263_p10), %v345_v1, %v344_v0  ;;  %v347_v4 = vld [vmem:[%s1982_s2 + $0x18] sm:$0xff] (!%p263_p10)  ;;  %v348_v5 = vld [vmem:[%s1983_s3] sm:$0xff] (!%p263_p10)  ;;  %1319 = vset.pattern.permute.xlu1 (!%p263_p10), %v1512_v6  ;;  %1328 = vset.pattern.permute.xlu0 (!%p263_p10), %v1512_v6  ;;  %vm1657_vm1 = vmpackc.low (!%p263_p10), %vm357_vm0, %vm357_vm0  ;;  %v1513_v15 = vmov (!%p263_p10), 1   ;;  %v1514_v19 = vmov (!%p263_p10), 2   ;;  %v1515_v23 = vmov (!%p263_p10), 3  }
  0x10   : > { %v1194_v7 = vpack.c.bf16 (!%p263_p10), %v347_v4, %v346_v2  ;;  %1187 = vmatprep.mubr.msk.f32.mxu1 (!%p263_p10), %vm357_vm0, %v348_v5  ;;  %v1644_v8 = vld [vmem:[%s1985_s5] ss:$0 sm:$0xff] (!%p263_p10)  ;;  %v1516_v26 = vmov (!%p263_p10), 4   ;;  %v1517_v28 = vmov (!%p263_p10), 5   ;;  %v1518_v32 = vmov (!%p263_p10), 6   ;;  %v349_v44 = vld [vmem:[%s1983_s3 + $0x8] sm:$0xff] (!%p263_p10) }
  0x11   : > { %1191 = vmatprep.subr.bf16.mxu0 (!%p263_p10), %v1190_v3  ;;  %593 = vperm.xlu1 (!%p263_p10), %1319, %v1644_v8   ;;  %v1519_v35 = vmov (!%p263_p10), 7   ;;  %v1520_v37 = vmov (!%p263_p10), 8   ;;  %v1521_v45 = vmov (!%p263_p10), 9   ;;  %v1090_v46 = vld [vmem:[%s1984_s4] ss:$0 sm:$0xff] (!%p263_p10)  ;;  %v1522_v50 = vmov (!%p263_p10), 10  }
  0x12   : > { %1193 = vmatpush3.bf16.msra.mxu0 (!%p263_p10), %v1190_v3  ;;  %v1523_v51 = vmov (!%p263_p10), 12   ;;  %v1524_v52 = vmov (!%p263_p10), 13   ;;  %v1525_v54 = vmov (!%p263_p10), 11   ;;  %v1526_v55 = vmov (!%p263_p10), 14   ;;  %s302_s28 = sand.u32 (!%p263_p10), 1, %s1494_s22   ;;  %s1119_s12 = sshll.u32 (!%p263_p10), %s1502_s24, 8 }
  0x13   : > { %1195 = vmatprep.subr.bf16.mxu0 (!%p263_p10), %v1194_v7  ;;  %v1527_v56 = vmov (!%p263_p10), 15   ;;  %s1085_s30 = sshll.u32 (!%p263_p10), %s302_s28, 4  ;;  %s1930_s15 = scalar_lea.hbm (!%p263_p10), %s1986_s6, %s1119_s12 }
  0x15   : > { %1320 = vset.pattern.permute.xlu1 (!%p263_p10), %v1513_v15 }
  0x16   : > { %s307_s27 = scalar_select %p306_p11, %s1502_s24, 1  ;;  %1197 = vmatpush3.bf16.msra.mxu0 %v1194_v7  ;;  %617 = vperm.xlu1 %1320, %v1644_v8  }
  0x17   : > { %s1934_s24 = scalar_lea.sflag [#allocation3], %s302_s28 }
  0x18   : > { %s1117_s8 = sshll.u32 %s307_s27, 4  ;;  %s1118_s11 = sshll.u32 %s307_s27, 7 }
  0x19   : > { %s313_s14 = scalar_lea.vmem %s1980_s0, %s1117_s8  ;;  %s1653_s17 = scalar_lea.vmem %s1981_s1, %s1118_s11 }
  0x1a   : > { %v326_v9 = vld [vmem:[%s313_s14] sm:$0xff]  ;;  %v329_v12 = vld [vmem:[%s1653_s17 + $0x8] sm:$0xff]  ;;  %v330_v13 = vld [vmem:[%s1653_s17 + $0x10] sm:$0xff]  ;;  %1321 = vset.pattern.permute.xlu1 %v1514_v19  ;;  %s304_s8 = scalar_lea.vmem [#allocation2], %s1085_s30 }
  0x1b   : > { %v328_v11 = vld [vmem:[%s1653_s17] sm:$0xff]  ;;  %1152 = vmatprep.mubr.msk.f32.mxu0 %vm357_vm0, %v326_v9  ;;  %v331_v14 = vld [vmem:[%s1653_s17 + $0x18] sm:$0xff]  ;;  %v327_v16 = vld [vmem:[%s313_s14 + $0x8] sm:$0xff]  ;;  %641 = vperm.xlu1 %1321, %v1644_v8   ;;  %v579_v9 = vlaneseq  ;;  %s979_s11 = sshll.u32 %s304_s8, 4  ;;  %s1925_s11 = int_to_ptr.vmem [resolvable:$true] %s979_s11 }
  0x1c   : > { %v1198_v17 = vpack.c.bf16 %v329_v12, %v328_v11  ;;  %v1204_v18 = vpack.c.bf16 %v331_v14, %v330_v13  ;;  %1153 = vmatmul.mubr.msk.f32.vlgmr.msra.gmra.mrb[0].mxu0 %vm357_vm0, %v327_v16  ;;  %v332_v20 = vld [vmem:[%s1653_s17 + $0x20] sm:$0xff]  ;;  %v333_v21 = vld [vmem:[%s1653_s17 + $0x28] sm:$0xff]  ;;  %v334_v24 = vld [vmem:[%s1653_s17 + $0x30] sm:$0xff]  ;;  %s1432_s16 = scalar_lea.vmem %s1925_s11, 256 }
  0x1d   : > { %v1210_v22 = vpack.c.bf16 %v333_v21, %v332_v20  ;;  %v335_v25 = vld [vmem:[%s1653_s17 + $0x38] sm:$0xff]  ;;  %v336_v29 = vld [vmem:[%s1653_s17 + $0x40] sm:$0xff]  ;;  %v337_v30 = vld [vmem:[%s1653_s17 + $0x48] sm:$0xff]  ;;  %v1794_v10 = vshrl.u32 %v579_v9, 7  ;;  %p1433_p12 = scmp.ne.s32.totalorder %s1925_s11, %s1432_s16 }
  0x1e   : > { %1200 = vmatprep.subr.msk.bf16.mxu1 %vm1657_vm1, %v1198_v17  ;;  %v1216_v27 = vpack.c.bf16 %v335_v25, %v334_v24  ;;  %v1222_v31 = vpack.c.bf16 %v337_v30, %v336_v29  ;;  %v338_v33 = vld [vmem:[%s1653_s17 + $0x50] sm:$0xff]  ;;  %v339_v34 = vld [vmem:[%s1653_s17 + $0x58] sm:$0xff]  ;;  %v340_v38 = vld [vmem:[%s1653_s17 + $0x60] sm:$0xff] }
  0x1f   : > { %1203 = vmatpush3.bf16.xpose.msk.msra.mxu1 %vm1657_vm1, %v1198_v17  ;;  %1322 = vset.pattern.permute.xlu1 %v1515_v23  ;;  %v1228_v36 = vpack.c.bf16 %v339_v34, %v338_v33  ;;  %v341_v39 = vld [vmem:[%s1653_s17 + $0x68] sm:$0xff]  ;;  %v342_v41 = vld [vmem:[%s1653_s17 + $0x70] sm:$0xff]  ;;  %v343_v42 = vld [vmem:[%s1653_s17 + $0x78] sm:$0xff]  ;;  %v581_v13 = vsub.s32 0, %v1794_v10  ;;  %v634_v16 = vsub.s32 2, %v1794_v10  ;;  %v682_v24 = vsub.s32 4, %v1794_v10  ;;  %p1434_p13 = pnand %p1433_p12, %p1606_p4 }
  0x20   : > { %1206 = vmatprep.subr.msk.bf16.mxu1 %vm1657_vm1, %v1204_v18  ;;  %665 = vperm.xlu1 %1322, %v1644_v8   ;;  %v1234_v40 = vpack.c.bf16 %v341_v39, %v340_v38  ;;  %v1240_v43 = vpack.c.bf16 %v343_v42, %v342_v41  ;;  %v730_v30 = vsub.s32 6, %v1794_v10  ;;  %s1528_s17 = smov [#allocation2]  }
  0x21   : > { %p1435_p0 = pneg %p1434_p13  ;;  %s1436_s18 = sshll.u32 %s1528_s17, 4  ;;  %s1437_s18 = int_to_ptr.vmem [resolvable:$false] %s1436_s18 }
  0x22   : > { %s1438_s19 = scalar_lea.vmem %s1437_s18, 512  ;;  %p1439_p1 = scmp.lt.s32.totalorder %s1925_s11, %s1437_s18 }
  0x23   : > { %p1440_p2 = scmp.lt.s32.totalorder %s1438_s19, %s1432_s16 }
  0x24   : > { %1323 = vset.pattern.permute.xlu1 %v1516_v26 }
  0x25   : > { %689 = vperm.xlu1 %1323, %v1644_v8   ;;  %p1441_p3 = por %p1440_p2, %p1439_p1 }
  0x27   : > { %1209 = vmatpush3.bf16.xpose.msk.msra.mxu1 %vm1657_vm1, %v1204_v18  ;;  %v658_v18 = vsub.s32 3, %v1794_v10  ;;  %p1442_p5 = pnand %p1441_p3, %p1435_p0 }
  0x28   : > { %1212 = vmatprep.subr.msk.bf16.mxu1 %vm1657_vm1, %v1210_v22 }
  0x29   : > { %1324 = vset.pattern.permute.xlu1 %v1517_v28 }
  0x2a   : > { %713 = vperm.xlu1 %1324, %v1644_v8  }
  0x2e   : > { %1325 = vset.pattern.permute.xlu1 %v1518_v32 }
  0x2f   : > { %1215 = vmatpush3.bf16.xpose.msk.msra.mxu1 %vm1657_vm1, %v1210_v22  ;;  %737 = vperm.xlu1 %1325, %v1644_v8  }
  0x30   : > { %1218 = vmatprep.subr.msk.bf16.mxu1 %vm1657_vm1, %v1216_v27 }
  0x33   : > { %1326 = vset.pattern.permute.xlu1 %v1519_v35 }
  0x34   : > { %761 = vperm.xlu1 %1326, %v1644_v8  }
  0x37   : > { %1221 = vmatpush3.bf16.xpose.msk.msra.mxu1 %vm1657_vm1, %v1216_v27 }
  0x38   : > { %1224 = vmatprep.subr.msk.bf16.mxu1 %vm1657_vm1, %v1222_v31  ;;  %1327 = vset.pattern.permute.xlu1 %v1520_v37 }
  0x39   : > { %785 = vperm.xlu1 %1327, %v1644_v8  }
  0x3d   : > { %1337 = vset.pattern.permute.xlu1 %v1521_v45 }
  0x3f   : > { %1227 = vmatpush3.bf16.xpose.msk.msra.mxu1 %vm1657_vm1, %v1222_v31 }
  0x40   : > { %1230 = vmatprep.subr.msk.bf16.mxu1 %vm1657_vm1, %v1228_v36 }
  0x47   : > { %1233 = vmatpush3.bf16.xpose.msk.msra.mxu1 %vm1657_vm1, %v1228_v36 }
  0x48   : > { %1236 = vmatprep.subr.msk.bf16.mxu1 %vm1657_vm1, %v1234_v40 }
  0x4f   : > { %1239 = vmatpush3.bf16.xpose.msk.msra.mxu1 %vm1657_vm1, %v1234_v40 }
  0x50   : > { %1242 = vmatprep.subr.msk.bf16.mxu1 %vm1657_vm1, %v1240_v43 }
  0x57   : > { %1245 = vmatpush3.bf16.xpose.msk.msra.mxu1 %vm1657_vm1, %v1240_v43 }
  0x5e   : > { %1188 = vmatmul.mubr.msk.f32.vlgmr.msra.gmra.mrb[0].mxu1 %vm357_vm0, %v349_v44 }
  0x90   : > { %v1764_v59 = vpop.permute.xlu1 %593 }
  0x95   : > { %v1768_v60 = vpop.permute.xlu1 %617 }
  0x9a   : > { %v1771_v61 = vpop.permute.xlu1 %641 }
  0x9f   : > { %v1775_v62 = vpop.permute.xlu1 %665 }
  0xa4   : > { %v1779_v63 = vpop.permute.xlu1 %689 }
  0xa9   : > { %v1783_v0 = vpop.permute.xlu1 %713 }
  0xae   : > { %v1786_v1 = vpop.permute.xlu1 %737 }
  0xb3   : > { %v1788_v2 = vpop.permute.xlu1 %761 }
  0xb8   : > { %v1790_v3 = vpop.permute.xlu1 %785 }
  0xef   : > { %v1154_v47 = vpop.f32.mrb[0].mxu0 }
  0xf0   : > { %v436_v48 = vadd.f32 %v1154_v47, %v1090_v46  ;;  %v430_v49 = vpop.f32.mrb[1].mxu0 }
  0xf1   : > { %v431_v53 = vadd.f32 %v1090_v46, %v430_v49 }
  0xf2   : > { %797 = vperm.xlu1 %1337, %v436_v48   ;;  %576 = vperm.xlu0 %1328, %v436_v48  }
  0xf6   : > { %1338 = vset.pattern.permute.xlu1 %v1522_v50  ;;  %1329 = vset.pattern.permute.xlu0 %v1513_v15 }
  0xf7   : > { %821 = vperm.xlu1 %1338, %v436_v48   ;;  %605 = vperm.xlu0 %1329, %v436_v48  }
  0xfb   : > { %1340 = vset.pattern.permute.xlu1 %v1523_v51  ;;  %1330 = vset.pattern.permute.xlu0 %v1514_v19 }
  0xfc   : > { %869 = vperm.xlu1 %1340, %v436_v48   ;;  %629 = vperm.xlu0 %1330, %v436_v48  }
 0x100   : > { %1341 = vset.pattern.permute.xlu1 %v1524_v52  ;;  %1331 = vset.pattern.permute.xlu0 %v1515_v23 }
 0x101   : > { %893 = vperm.xlu1 %1341, %v436_v48   ;;  %653 = vperm.xlu0 %1331, %v436_v48  }
 0x105   : > { %1345 = vset.pattern.permute.xlu1 %v1521_v45  ;;  %1332 = vset.pattern.permute.xlu0 %v1516_v26 }
 0x106   : > { %809 = vperm.xlu1 %1345, %v1644_v8   ;;  %677 = vperm.xlu0 %1332, %v436_v48  }
 0x10a   : > { %1346 = vset.pattern.permute.xlu1 %v1513_v15  ;;  %1333 = vset.pattern.permute.xlu0 %v1517_v28 }
 0x10b   : > { %701 = vperm.xlu0 %1333, %v436_v48   ;;  %601 = vperm.xlu1 %1346, %v431_v53  }
 0x10f   : > { %1334 = vset.pattern.permute.xlu0 %v1518_v32  ;;  %1347 = vset.pattern.permute.xlu1 %v1514_v19 }
 0x110   : > { %725 = vperm.xlu0 %1334, %v436_v48   ;;  %625 = vperm.xlu1 %1347, %v431_v53  }
 0x114   : > { %1335 = vset.pattern.permute.xlu0 %v1519_v35  ;;  %1348 = vset.pattern.permute.xlu1 %v1515_v23 }
 0x115   : > { %749 = vperm.xlu0 %1335, %v436_v48   ;;  %649 = vperm.xlu1 %1348, %v431_v53  }
 0x119   : > { %1336 = vset.pattern.permute.xlu0 %v1520_v37  ;;  %1349 = vset.pattern.permute.xlu1 %v1516_v26 }
 0x11a   : > { %773 = vperm.xlu0 %1336, %v436_v48   ;;  %673 = vperm.xlu1 %1349, %v431_v53  }
 0x11e   : > { %1339 = vset.pattern.permute.xlu0 %v1525_v54  ;;  %1350 = vset.pattern.permute.xlu1 %v1517_v28  ;;  %v706_v28 = vsub.s32 5, %v1794_v10 }
 0x11f   : > { %845 = vperm.xlu0 %1339, %v436_v48   ;;  %697 = vperm.xlu1 %1350, %v431_v53  }
 0x123   : > { %1342 = vset.pattern.permute.xlu0 %v1526_v55  ;;  %1351 = vset.pattern.permute.xlu1 %v1518_v32 }
 0x124   : > { %917 = vperm.xlu0 %1342, %v436_v48   ;;  %721 = vperm.xlu1 %1351, %v431_v53  }
 0x128   : > { %1343 = vset.pattern.permute.xlu0 %v1512_v6  ;;  %1352 = vset.pattern.permute.xlu1 %v1519_v35 }
 0x129   : > { %745 = vperm.xlu1 %1352, %v431_v53   ;;  %571 = vperm.xlu0 %1343, %v431_v53  }
 0x12d   : > { %1353 = vset.pattern.permute.xlu1 %v1520_v37  ;;  %1344 = vset.pattern.permute.xlu0 %v1527_v56  ;;  %v754_v37 = vsub.s32 7, %v1794_v10 }
 0x12e   : > { %769 = vperm.xlu1 %1353, %v431_v53   ;;  %941 = vperm.xlu0 %1344, %v436_v48  }
 0x131   : > { %v1757_v57 = vpop.f32.mrb[0].mxu1 }
 0x132   : > { %v1759_v58 = vpop.f32.mrb[1].mxu1  ;;  %1354 = vset.pattern.permute.xlu1 %v1521_v45  ;;  %1355 = vset.pattern.permute.xlu0 %v1522_v50 }
 0x133   : > { %793 = vperm.xlu1 %1354, %v431_v53   ;;  %817 = vperm.xlu0 %1355, %v431_v53   ;;  %v1808_v19 = vrot.slane %v1759_v58, %v581_v13  ;;  %v1813_v20 = vrot.slane %v1759_v58, %v634_v16  ;;  %v1822_v25 = vrot.slane %v1759_v58, %v658_v18 }
 0x134   : > { %v1830_v29 = vrot.slane %v1759_v58, %v682_v24  ;;  %v1837_v32 = vrot.slane %v1759_v58, %v706_v28  ;;  %v1843_v36 = vrot.slane %v1759_v58, %v730_v30  ;;  %v1851_v42 = vrot.slane %v1759_v58, %v754_v37 }
 0x137   : > { %1356 = vset.pattern.permute.xlu1 %v1525_v54  ;;  %1358 = vset.pattern.permute.xlu0 %v1524_v52 }
 0x138   : > { %841 = vperm.xlu1 %1356, %v431_v53   ;;  %889 = vperm.xlu0 %1358, %v431_v53  }
 0x13c   : > { %1357 = vset.pattern.permute.xlu1 %v1523_v51  ;;  %1362 = vset.pattern.permute.xlu0 %v1525_v54 }
 0x13d   : > { %865 = vperm.xlu1 %1357, %v431_v53   ;;  %857 = vperm.xlu0 %1362, %v1644_v8  }
 0x141   : > { %1359 = vset.pattern.permute.xlu1 %v1526_v55  ;;  %1365 = vset.pattern.permute.xlu0 %v1526_v55 }
 0x142   : > { %913 = vperm.xlu1 %1359, %v431_v53   ;;  %929 = vperm.xlu0 %1365, %v1644_v8  }
 0x146   : > { %1360 = vset.pattern.permute.xlu1 %v1527_v56  ;;  %1367 = vset.pattern.permute.xlu0 %v1527_v56 }
 0x147   : > { %937 = vperm.xlu1 %1360, %v431_v53  }
 0x14b   : > { %1361 = vset.pattern.permute.xlu1 %v1522_v50  ;;  %v779_v50 = vrot.slane %v1757_v57, %v581_v13 }
 0x14c   : > { %833 = vperm.xlu1 %1361, %v1644_v8  }
 0x150   : > { %1363 = vset.pattern.permute.xlu1 %v1523_v51 }
 0x151   : > { %881 = vperm.xlu1 %1363, %v1644_v8  }
 0x155   : > { %1364 = vset.pattern.permute.xlu1 %v1524_v52 }
 0x156   : > { %905 = vperm.xlu1 %1364, %v1644_v8  }
 0x15a   : > { %1366 = vset.pattern.permute.xlu1 %v1527_v56 }
 0x15b   : > { %953 = vperm.xlu1 %1366, %v1644_v8   ;;  %v610_v8 = vsub.s32 1, %v1794_v10 }
 0x15d   : > { %v1804_v17 = vrot.slane %v1759_v58, %v610_v8  ;;  %v1855_v49 = vrot.slane %v1757_v57, %v610_v8 }
 0x171   : > { %v798_v4 = vpop.permute.xlu1 %797  ;;  %v577_v5 = vpop.permute.xlu0 %576 }
 0x172   : > { %v584_v26 = vadd.f32 %v1808_v19, %v577_v5  ;;  %v805_v5 = vadd.f32 %v1855_v49, %v798_v4 }
 0x176   : > { %v1792_v6 = vpop.permute.xlu1 %821  ;;  %v606_v7 = vpop.permute.xlu0 %605 }
 0x177   : > { %v613_v23 = vadd.f32 %v1804_v17, %v606_v7 }
 0x179   : > { %1368 = vtanh.f32 %v613_v23 }
 0x17a   : > { %1370 = vtanh.f32 %v584_v26 }
 0x17b   : > { %v1796_v11 = vpop.permute.xlu1 %869  ;;  %v630_v12 = vpop.permute.xlu0 %629 }
 0x17c   : > { %v637_v27 = vadd.f32 %v1813_v20, %v630_v12 }
 0x17e   : > { %1372 = vtanh.f32 %v637_v27 }
 0x180   : > { %v1800_v14 = vpop.permute.xlu1 %893  ;;  %v654_v15 = vpop.permute.xlu0 %653 }
 0x181   : > { %v661_v31 = vadd.f32 %v1822_v25, %v654_v15 }
 0x183   : > { %1374 = vtanh.f32 %v661_v31  ;;  %v1369_v43 = vpop.eup %1368 }
 0x184   : > { %v1371_v46 = vpop.eup %1370  ;;  %v621_v51 = vmul.f32 %v1369_v43, %v1768_v60 }
 0x185   : > { %v1815_v21 = vpop.permute.xlu1 %809  ;;  %v678_v22 = vpop.permute.xlu0 %677  ;;  %v597_v53 = vmul.f32 %v1371_v46, %v1764_v59 }
 0x186   : > { %v685_v35 = vadd.f32 %v1830_v29, %v678_v22 }
 0x187   : > { %v623_v9 = vadd.f32 %v621_v51, %v597_v53 }
 0x188   : > { %1376 = vtanh.f32 %v685_v35  ;;  %v1373_v48 = vpop.eup %1372 }
 0x189   : > { %v645_v54 = vmul.f32 %v1373_v48, %v1771_v61 }
 0x18a   : > { %v702_v33 = vpop.permute.xlu0 %701  ;;  %v602_v34 = vpop.permute.xlu1 %601 }
 0x18b   : > { %v709_v38 = vadd.f32 %v1837_v32, %v702_v33  ;;  %v647_v13 = vadd.f32 %v645_v54, %v623_v9 }
 0x18d   : > { %1378 = vtanh.f32 %v709_v38  ;;  %v1375_v52 = vpop.eup %1374 }
 0x18e   : > { %v669_v12 = vmul.f32 %v1375_v52, %v1775_v62 }
 0x18f   : > { %v726_v39 = vpop.permute.xlu0 %725  ;;  %v626_v40 = vpop.permute.xlu1 %625 }
 0x190   : > { %v733_v41 = vadd.f32 %v1843_v36, %v726_v39  ;;  %v671_v27 = vadd.f32 %v669_v12, %v647_v13  ;;  %v636_v48 = vadd.f32 %v1813_v20, %v626_v40 }
 0x192   : > { %1380 = vtanh.f32 %v733_v41  ;;  %v1377_v58 = vpop.eup %1376 }
 0x193   : > { %v693_v15 = vmul.f32 %v1377_v58, %v1779_v63 }
 0x194   : > { %v750_v44 = vpop.permute.xlu0 %749  ;;  %v650_v45 = vpop.permute.xlu1 %649 }
 0x195   : > { %v757_v47 = vadd.f32 %v1851_v42, %v750_v44  ;;  %v695_v35 = vadd.f32 %v693_v15, %v671_v27  ;;  %v660_v9 = vadd.f32 %v1822_v25, %v650_v45 }
 0x197   : > { %1382 = vtanh.f32 %v757_v47  ;;  %v1379_v8 = vpop.eup %1378  ;;  %v612_v47 = vadd.f32 %v1804_v17, %v602_v34 }
 0x198   : > { %v717_v31 = vmul.f32 %v1379_v8, %v1783_v0 }
 0x199   : > { %v774_v55 = vpop.permute.xlu0 %773  ;;  %v674_v56 = vpop.permute.xlu1 %673 }
 0x19a   : > { %v781_v7 = vadd.f32 %v779_v50, %v774_v55  ;;  %v719_v41 = vadd.f32 %v717_v31, %v695_v35  ;;  %v684_v17 = vadd.f32 %v1830_v29, %v674_v56 }
 0x19c   : > { %1384 = vtanh.f32 %v781_v7  ;;  %v1381_v22 = vpop.eup %1380 }
 0x19d   : > { %1386 = vtanh.f32 %v805_v5  ;;  %v741_v4 = vmul.f32 %v1381_v22, %v1786_v1 }
 0x19e   : > { %v1864_v23 = vpop.permute.xlu0 %845  ;;  %v698_v26 = vpop.permute.xlu1 %697  ;;  %1388 = vtanh.f32 %v612_v47 }
 0x19f   : > { %v743_v44 = vadd.f32 %v741_v4, %v719_v41  ;;  %1390 = vtanh.f32 %v636_v48  ;;  %v708_v34 = vadd.f32 %v1837_v32, %v698_v26  ;;  %v827_v32 = vrot.slane %v1757_v57, %v634_v16 }
 0x1a0   : > { %v851_v16 = vrot.slane %v1757_v57, %v658_v18  ;;  %v899_v48 = vrot.slane %v1757_v57, %v706_v28  ;;  %v923_v28 = vrot.slane %v1757_v57, %v730_v30 }
 0x1a1   : > { %v1383_v33 = vpop.eup %1382  ;;  %v829_v35 = vadd.f32 %v827_v32, %v1792_v6 }
 0x1a2   : > { %v765_v43 = vmul.f32 %v1383_v33, %v1788_v2 }
 0x1a3   : > { %v1868_v38 = vpop.permute.xlu0 %917  ;;  %v722_v39 = vpop.permute.xlu1 %721 }
 0x1a4   : > { %v767_v51 = vadd.f32 %v765_v43, %v743_v44  ;;  %v732_v40 = vadd.f32 %v1843_v36, %v722_v39  ;;  %v925_v30 = vadd.f32 %v923_v28, %v1868_v38 }
 0x1a6   : > { %v1385_v46 = vpop.eup %1384 }
 0x1a7   : > { %v789_v52 = vmul.f32 %v1385_v46, %v1790_v3  ;;  %v1387_v53 = vpop.eup %1386 }
 0x1a8   : > { %v746_v54 = vpop.permute.xlu1 %745  ;;  %v572_v55 = vpop.permute.xlu0 %571  ;;  %v813_v58 = vmul.f32 %v1387_v53, %v1815_v21 }
 0x1a9   : > { %v583_v5 = vadd.f32 %v1808_v19, %v572_v55  ;;  %v791_v7 = vadd.f32 %v789_v52, %v767_v51  ;;  %v756_v19 = vadd.f32 %v1851_v42, %v746_v54  ;;  %v1389_v25 = vpop.eup %1388 }
 0x1aa   : > { %v1391_v15 = vpop.eup %1390  ;;  %v620_v36 = vmul.f32 %v1389_v25, %v1768_v60 }
 0x1ab   : > { %v1877_v12 = vadd.f32 %v813_v58, %v791_v7  ;;  %1392 = vtanh.f32 %v583_v5  ;;  %v644_v27 = vmul.f32 %v1391_v15, %v1771_v61  ;;  %v875_v61 = vrot.slane %v1757_v57, %v682_v24 }
 0x1ac   : > { %1394 = vtanh.f32 %v660_v9 }
 0x1ad   : > { %v770_v20 = vpop.permute.xlu1 %769  ;;  %1396 = vtanh.f32 %v684_v17  ;;  %v1883_v13 = vpop.permute.xlu0 %941  ;;  %v877_v51 = vadd.f32 %v875_v61, %v1796_v11  ;;  %v901_v11 = vadd.f32 %v899_v48, %v1800_v14  ;;  %v947_v17 = vrot.slane %v1757_v57, %v754_v37 }
 0x1ae   : > { %1398 = vtanh.f32 %v708_v34  ;;  %v780_v45 = vadd.f32 %v779_v50, %v770_v20 }
 0x1af   : > { %1400 = vtanh.f32 %v732_v40 }
 0x1b0   : > { %1402 = vtanh.f32 %v756_v19 }
 0x1b1   : > { %1404 = vtanh.f32 %v780_v45 }
 0x1b2   : > { %v794_v8 = vpop.permute.xlu1 %793  ;;  %v818_v50 = vpop.permute.xlu0 %817 }
 0x1b3   : > { %v804_v29 = vadd.f32 %v1855_v49, %v794_v8  ;;  %v949_v8 = vadd.f32 %v947_v17, %v1883_v13 }
 0x1b5   : > { %v1393_v22 = vpop.eup %1392  ;;  %1406 = vtanh.f32 %v804_v29 }
 0x1b6   : > { %v596_v56 = vmul.f32 %v1393_v22, %v1764_v59  ;;  %v1395_v26 = vpop.eup %1394  ;;  %v828_v59 = vadd.f32 %v827_v32, %v818_v50  ;;  %1408 = vtanh.f32 %v829_v35 }
 0x1b7   : > { %v842_v42 = vpop.permute.xlu1 %841  ;;  %v1397_v33 = vpop.eup %1396  ;;  %v668_v49 = vmul.f32 %v1395_v26, %v1775_v62  ;;  %v853_v62 = vadd.f32 %v851_v16, %v1864_v23 }
 0x1b8   : > { %v622_v31 = vadd.f32 %v620_v36, %v596_v56  ;;  %v1399_v4 = vpop.eup %1398  ;;  %v692_v41 = vmul.f32 %v1397_v33, %v1779_v63  ;;  %v852_v43 = vadd.f32 %v851_v16, %v842_v42  ;;  %1410 = vtanh.f32 %v828_v59  ;;  %v890_v23 = vpop.permute.xlu0 %889 }
 0x1b9   : > { %v1401_v46 = vpop.eup %1400  ;;  %v716_v6 = vmul.f32 %v1399_v4, %v1783_v0  ;;  %v900_v7 = vadd.f32 %v899_v48, %v890_v23 }
 0x1ba   : > { %v646_v60 = vadd.f32 %v644_v27, %v622_v31  ;;  %v1403_v18 = vpop.eup %1402  ;;  %v740_v24 = vmul.f32 %v1401_v46, %v1786_v1  ;;  %1412 = vtanh.f32 %v852_v43 }
 0x1bb   : > { %v1405_v53 = vpop.eup %1404  ;;  %1414 = vtanh.f32 %v853_v62  ;;  %v764_v0 = vmul.f32 %v1403_v18, %v1788_v2 }
 0x1bc   : > { %v866_v39 = vpop.permute.xlu1 %865  ;;  %v670_v44 = vadd.f32 %v668_v49, %v646_v60  ;;  %1416 = vtanh.f32 %v877_v51  ;;  %v788_v1 = vmul.f32 %v1405_v53, %v1790_v3  ;;  %v858_v25 = vpop.permute.xlu0 %857 }
 0x1bd   : > { %v876_v54 = vadd.f32 %v875_v61, %v866_v39 }
 0x1be   : > { %v694_v47 = vadd.f32 %v692_v41, %v670_v44 }
 0x1bf   : > { %v1407_v58 = vpop.eup %1406  ;;  %1418 = vtanh.f32 %v876_v54 }
 0x1c0   : > { %v718_v52 = vadd.f32 %v716_v6, %v694_v47  ;;  %v812_v20 = vmul.f32 %v1407_v58, %v1815_v21  ;;  %v1409_v40 = vpop.eup %1408  ;;  %1420 = vtanh.f32 %v901_v11 }
 0x1c1   : > { %v914_v63 = vpop.permute.xlu1 %913  ;;  %1422 = vtanh.f32 %v900_v7  ;;  %v930_v16 = vpop.permute.xlu0 %929 }
 0x1c2   : > { %v742_v55 = vadd.f32 %v740_v24, %v718_v52  ;;  %v924_v2 = vadd.f32 %v923_v28, %v914_v63  ;;  %v1411_v14 = vpop.eup %1410 }
 0x1c4   : > { %v766_v5 = vadd.f32 %v764_v0, %v742_v55  ;;  %v1413_v3 = vpop.eup %1412  ;;  %1424 = vtanh.f32 %v924_v2 }
 0x1c5   : > { %v1415_v15 = vpop.eup %1414  ;;  %1426 = vtanh.f32 %v925_v30  ;;  %v860_v21 = vmul.f32 %v1413_v3, %v858_v25 }
 0x1c6   : > { %v938_v9 = vpop.permute.xlu1 %937  ;;  %v790_v34 = vadd.f32 %v788_v1, %v766_v5  ;;  %v861_v22 = vmul.f32 %v1415_v15, %v858_v25  ;;  %v1417_v32 = vpop.eup %1416  ;;  %1428 = vtanh.f32 %v949_v8 }
 0x1c7   : > { %v948_v10 = vadd.f32 %v947_v17, %v938_v9 }
 0x1c8   : > { %v814_v19 = vadd.f32 %v812_v20, %v790_v34 }
 0x1c9   : > { %v1419_v36 = vpop.eup %1418  ;;  %1430 = vtanh.f32 %v948_v10 }
 0x1ca   : > { %v1421_v31 = vpop.eup %1420 }
 0x1cb   : > { %v834_v45 = vpop.permute.xlu1 %833  ;;  %v1423_v35 = vpop.eup %1422 }
 0x1cc   : > { %v836_v57 = vmul.f32 %v1411_v14, %v834_v45  ;;  %v837_v37 = vmul.f32 %v1409_v40, %v834_v45 }
 0x1ce   : > { %v838_v29 = vadd.f32 %v836_v57, %v814_v19  ;;  %v839_v38 = vadd.f32 %v837_v37, %v1877_v12  ;;  %v1425_v49 = vpop.eup %1424 }
 0x1cf   : > { %v1427_v59 = vpop.eup %1426  ;;  %v932_v39 = vmul.f32 %v1425_v49, %v930_v16 }
 0x1d0   : > { %v882_v13 = vpop.permute.xlu1 %881  ;;  %v862_v56 = vadd.f32 %v860_v21, %v838_v29  ;;  %v863_v42 = vadd.f32 %v861_v22, %v839_v38  ;;  %v933_v61 = vmul.f32 %v1427_v59, %v930_v16  ;;  %v1429_v44 = vpop.eup %1428 }
 0x1d1   : > { %v884_v26 = vmul.f32 %v1419_v36, %v882_v13  ;;  %v885_v27 = vmul.f32 %v1417_v32, %v882_v13 }
 0x1d3   : > { %v886_v50 = vadd.f32 %v884_v26, %v862_v56  ;;  %v887_v33 = vadd.f32 %v885_v27, %v863_v42  ;;  %v1431_v46 = vpop.eup %1430 }
 0x1d5   : > { %v906_v12 = vpop.permute.xlu1 %905 }
 0x1d6   : > { %v908_v60 = vmul.f32 %v1423_v35, %v906_v12  ;;  %v909_v4 = vmul.f32 %v1421_v31, %v906_v12 }
 0x1d8   : > { %v910_v41 = vadd.f32 %v908_v60, %v886_v50  ;;  %v911_v43 = vadd.f32 %v909_v4, %v887_v33 }
 0x1da   : > { %v954_v62 = vpop.permute.xlu1 %953  ;;  %v934_v6 = vadd.f32 %v932_v39, %v910_v41  ;;  %v935_v47 = vadd.f32 %v933_v61, %v911_v43 }
 0x1db   : > { %v956_v18 = vmul.f32 %v1431_v46, %v954_v62  ;;  %v957_v48 = vmul.f32 %v1429_v44, %v954_v62 }
 0x1dd   : > { %v958_v51 = vadd.f32 %v956_v18, %v934_v6  ;;  %v959_v24 = vadd.f32 %v957_v48, %v935_v47 }
 0x1df   : > { %960 = vst [vmem:[%s304_s8] sm:$0xff] %v958_v51  ;;  %961 = vst [vmem:[%s304_s8 + $0x8] sm:$0xff] %v959_v24 }
 0x1e0   : > { %1445 = shalt.err (!%p1442_p5)
}
 0x1e1   : > { %s1446_s20 = scalar_lea.hbm %s1930_s15, 256  ;;  %s1450_s30 = scalar_lea.hbm %s1986_s6, 512 }
 0x1e2   : > { %p1447_p6 = scmp.ne.s32.totalorder %s1930_s15, %s1446_s20  ;;  %p1451_p10 = scmp.lt.u32.totalorder %s1930_s15, %s1986_s6 }
 0x1e3   : > { %p1452_p11 = scmp.lt.u32.totalorder %s1450_s30, %s1446_s20  ;;  %p1454_p13 = scmp.lt.u32.totalorder %s1446_s20, %s1930_s15 }
 0x1e4   : > { %p1448_p7 = pnand %p1447_p6, %p1606_p4 }
 0x1e5   : > { %p1453_p12 = por %p1452_p11, %p1451_p10 }
 0x1e6   : > { %p1449_p9 = pneg %p1448_p7 }
 0x1e7   : > { %p1455_p0 = por %p1454_p13, %p1453_p12 }
 0x1e9   : > { %p1456_p1 = pnand %p1455_p0, %p1449_p9 }
 0x1eb   : > { %1459 = shalt.err (!%p1456_p1)
}
 0x1ec   : > { %s1529_s13 = smov 128   ;;  %s1530_s14 = smov 8  }
 0x1ed   : > { %1246 = dma.vmem_to_hbm [thread:$0]  (%p1606_p4), %s1925_s11, 256, %s1930_s15, %s1934_s24, %s1529_s13, %s1529_s13, %s1530_s14  }
 0x1ee PF: > { %p1252_p2 = scmp.ge.s32.totalorder %s1510_s26, 2  ;;  %s994_s16 = sand.u32 1, %s1490_s21  }
 0x1ef   : > { %s995_s17 = scalar_lea.sflag [#allocation3], %s994_s16 }
 0x1f0   : > { %p1249_p3 = pnand %p1252_p2, %p1613_p8 }
 0x1f2   : > { %1485 = dma.done.wait (!%p1249_p3), %s995_s17, 256  }
 0x1f3   : > { %1487 = vsyncadd (!%p1249_p3), %s995_s17, 4294967040  ;;  %s19_s26 = sadd.s32 1, %s1510_s26   ;;  %s1991_s21 = smov %s1494_s22 }
 0x1f4   : > { %p16_p5 = scmp.ge.s32.totalorder %s19_s26, 4   ;;  %s1992_s22 = smov %s1498_s23 }
 0x1f5   : > { %s1993_s23 = smov %s1619_s10  ;;  %s1994_s24 = smov %s1506_s25 }
 0x1f6   : > { %s1995_s25 = smov %s1997_s29  ;;  %18 = sbr.rel (!%p16_p5) target bundleno = 4 (0x4), region = 82 }
 0x1fd   :  { %1000 = vsyncpa [#allocation3], 1 }
 0x1fe   :  { %1002 = vsyncpa [#allocation3 + $0x1], 1 }

</bundles_post_ra>
